<compile_context>
chip_gen: v6e
topology: v6e:2x2x1
jax: 0.10.0
libtpu: 0.0.40
codegen_flags: <defaults>
</compile_context>

<pallas_src>
import jax
import jax.numpy as jnp
from jax import lax
from jax.experimental import pallas as pl
from jax.experimental.pallas import tpu as pltpu

# ---- model hyper-params (PolicyNetwork defaults) ----
BOARD_H, BOARD_W = 6, 7
BOARD_LEN = BOARD_H * BOARD_W                    # 42
BOARD_PAD = 48                                   # 42 padded to sublane/bf16-pack multiple
NUM_PLAYERS = 2
PLAYER_DIM = NUM_PLAYERS + 1                     # 3
ENC_DIM = 2
CONV_FILTERS = 16
KH = KW = 4
OH, OW = BOARD_H - KH + 1, BOARD_W - KW + 1      # 3, 4
CONV_FLAT = CONV_FILTERS * OH * OW               # 192
FOLD_K = 2 * BOARD_PAD                           # 96: [board==1 ; board==2] rows
LINEAR_DIMS = [64, 32, 16]
OUT_DIM = BOARD_W                                # 7
OUT_PAD = 8                                      # padded to 8 sublanes


def _round_up(x, m):
    return (x + m - 1) // m * m


# --------------------------------------------------------------------------
# Kernel: in-kernel one-hot + fused (conv-as-matmul, 3x Linear+ReLU, output).
# All activations are (features, batch_tile); batch is the lane dimension.
# --------------------------------------------------------------------------
def policy_kernel(xb_ref, xp_ref, wc_ref, bc_ref, w1a_ref, w1b_ref, b1_ref,
                  w2_ref, b2_ref, w3_ref, b3_ref, wo_ref, bo_ref, out_ref):
    board = xb_ref[...]                                       # (48, TB) int32
    # One-hot built on the VPU; the "==0" plane is folded into the bias at prep.
    e1 = (board == 1).astype(jnp.bfloat16)                    # (48, TB)
    e2 = (board == 2).astype(jnp.bfloat16)                    # (48, TB)
    xb = jnp.concatenate([e1, e2], axis=0)                    # (96, TB), aligned

    # (embedding o conv o one-hot) as a single bf16 MXU pass, f32 accumulate.
    x0 = jnp.dot(wc_ref[...], xb, preferred_element_type=jnp.float32) + bc_ref[...]
    x0 = jnp.maximum(x0, 0.0).astype(jnp.bfloat16)            # (192, TB)

    # Linear(194 -> 64): conv-feature part on the MXU; turn-player part as a
    # per-example bias selection (three VPU broadcast mul-adds, no K=3 matmul).
    tp = xp_ref[...]                                          # (1, TB) int32
    w1b = w1b_ref[...]                                        # (64, 3) f32
    h = jnp.dot(w1a_ref[...], x0, preferred_element_type=jnp.float32) + b1_ref[...]
    h = h + w1b[:, 0:1] * (tp == 0).astype(jnp.float32)
    h = h + w1b[:, 1:2] * (tp == 1).astype(jnp.float32)
    h = h + w1b[:, 2:3] * (tp == 2).astype(jnp.float32)
    h = jnp.maximum(h, 0.0).astype(jnp.bfloat16)              # (64, TB)

    h = jnp.maximum(jnp.dot(w2_ref[...], h, preferred_element_type=jnp.float32)
                    + b2_ref[...], 0.0).astype(jnp.bfloat16)  # (32, TB)
    h = jnp.maximum(jnp.dot(w3_ref[...], h, preferred_element_type=jnp.float32)
                    + b3_ref[...], 0.0).astype(jnp.bfloat16)  # (16, TB)

    out_ref[...] = (jnp.dot(wo_ref[...], h, preferred_element_type=jnp.float32)
                    + bo_ref[...])                            # (8, TB) f32


# --------------------------------------------------------------------------
# Parameters (raw PyTorch-like) and folded/transposed kernel parameters.
# --------------------------------------------------------------------------
def init_params(key):
    ks = jax.random.split(key, 11)

    def u(k, shape, scale):
        return jax.random.uniform(k, shape, jnp.float32, -scale, scale)

    return {
        "emb": u(ks[0], (PLAYER_DIM, ENC_DIM), 1.0),           # Embedding(3, 2)
        "wc": u(ks[1], (CONV_FILTERS, ENC_DIM, KH, KW), 0.3),  # Conv2d OIHW
        "bc": u(ks[2], (CONV_FILTERS,), 0.3),
        "w1": u(ks[3], (CONV_FLAT + ENC_DIM, LINEAR_DIMS[0]), 0.1),  # weight.T
        "b1": u(ks[4], (LINEAR_DIMS[0],), 0.1),
        "w2": u(ks[5], (LINEAR_DIMS[0], LINEAR_DIMS[1]), 0.1),
        "b2": u(ks[6], (LINEAR_DIMS[1],), 0.1),
        "w3": u(ks[7], (LINEAR_DIMS[1], LINEAR_DIMS[2]), 0.1),
        "b3": u(ks[8], (LINEAR_DIMS[2],), 0.1),
        "wo": u(ks[9], (LINEAR_DIMS[2], OUT_DIM), 0.1),
        "bo": u(ks[10], (OUT_DIM,), 0.1),
    }


def prepare_kernel_params(p):
    """Fold embedding + im2col + the value-0 one-hot plane into the conv weight,
    transpose everything to feature-major, cast MXU weights to bf16."""
    emb, wc, bc = p["emb"], p["wc"], p["bc"]

    # w84[c*42 + s, co*12 + oh*4 + ow] = wc[co, c, h-oh, w-ow] (valid taps), s=h*7+w.
    wc_t = jnp.transpose(wc, (1, 2, 3, 0))                    # (c, kh, kw, co)
    w84_6 = jnp.zeros((ENC_DIM, BOARD_H, BOARD_W, CONV_FILTERS, OH, OW),
                      jnp.float32)
    for oh in range(OH):
        for ow in range(OW):
            w84_6 = w84_6.at[:, oh:oh + KH, ow:ow + KW, :, oh, ow].set(wc_t)
    w84 = w84_6.reshape(ENC_DIM * BOARD_LEN, CONV_FLAT)       # (84, 192)

    # Fold player embedding: W_v[s, j] = sum_c emb[v, c] * w84[c*42 + s, j].
    w_v = jnp.einsum("vc,csj->vsj", emb,
                     w84.reshape(ENC_DIM, BOARD_LEN, CONV_FLAT))   # (3, 42, 192)

    # Fold the value-0 plane via e0 = 1 - e1 - e2:
    #   x0 = (W1 - W0) @ e1 + (W2 - W0) @ e2 + (conv_bias + sum_s W0[s]).
    w_e1 = w_v[1] - w_v[0]                                    # (42, 192)
    w_e2 = w_v[2] - w_v[0]
    pad = BOARD_PAD - BOARD_LEN
    w_e1 = jnp.pad(w_e1, ((0, pad), (0, 0)))                  # (48, 192)
    w_e2 = jnp.pad(w_e2, ((0, pad), (0, 0)))
    wc_fold = jnp.concatenate([w_e1, w_e2], axis=0)           # (96, 192)
    bc_col = (jnp.repeat(bc, OH * OW) + w_v[0].sum(axis=0)).reshape(CONV_FLAT, 1)

    w1a = p["w1"][:CONV_FLAT]                                 # (192, 64)
    w1b_fold = emb @ p["w1"][CONV_FLAT:]                      # (3, 64) turn-player part

    # Pad the output layer 7 -> 8 rows for sublane-dense stores.
    wo_pad = jnp.pad(p["wo"].T, ((0, OUT_PAD - OUT_DIM), (0, 0)))   # (8, 16)
    bo_pad = jnp.pad(p["bo"], (0, OUT_PAD - OUT_DIM)).reshape(-1, 1)

    bf16 = jnp.bfloat16
    return {
        "wcT": wc_fold.T.astype(bf16),      # (192, 96)
        "bcT": bc_col,                      # (192, 1) f32
        "w1aT": w1a.T.astype(bf16),         # (64, 192)
        "w1bT": w1b_fold.T,                 # (64, 3) f32 (VPU path)
        "b1T": p["b1"].reshape(-1, 1),      # (64, 1)
        "w2T": p["w2"].T.astype(bf16), "b2T": p["b2"].reshape(-1, 1),
        "w3T": p["w3"].T.astype(bf16), "b3T": p["b3"].reshape(-1, 1),
        "woT": wo_pad.astype(bf16), "boT": bo_pad,
    }


# --------------------------------------------------------------------------
# Forward wrapper.
# --------------------------------------------------------------------------
def policy_forward_pallas(boards, turn_players, kp, block_b=None):
    B = boards.shape[0]
    if block_b is None:
        # Cap 1024 lanes; aim for >=2 grid steps at large B so the "parallel"
        # batch axis can shard across both TensorCores on v7x.
        tb = min(1024, _round_up(-(-B // 2), 128))
    else:
        assert block_b % 128 == 0
        tb = block_b
    b_pad = _round_up(B, tb)

    # Glue: batch-last raw board (padded cells + batch) and turn-player row.
    boards_t = boards.reshape(B, BOARD_LEN).T.astype(jnp.int32)        # (42, B)
    boards_t = jnp.pad(boards_t,
                       ((0, BOARD_PAD - BOARD_LEN), (0, b_pad - B)))   # (48, Bp)
    tp = turn_players.reshape(1, B).astype(jnp.int32)
    tp = jnp.pad(tp, ((0, 0), (0, b_pad - B)))                         # (1, Bp)

    weights = (kp["wcT"], kp["bcT"], kp["w1aT"], kp["w1bT"], kp["b1T"],
               kp["w2T"], kp["b2T"], kp["w3T"], kp["b3T"], kp["woT"], kp["boT"])

    def batch_block(rows):
        return pl.BlockSpec((rows, tb), lambda i: (0, i))

    def resident(shape):
        return pl.BlockSpec(shape, lambda i: (0, 0))

    in_specs = [batch_block(BOARD_PAD), batch_block(1)]
    in_specs += [resident(w.shape) for w in weights]

    flops = 2 * b_pad * (FOLD_K * CONV_FLAT + CONV_FLAT * 64 + 64 * 32
                         + 32 * 16 + 16 * OUT_PAD)
    weight_bytes = sum(int(w.size) * w.dtype.itemsize for w in weights)
    bytes_accessed = (b_pad * (BOARD_PAD * 4 + 4 + OUT_PAD * 4) + weight_bytes)

    out_t = pl.pallas_call(
        policy_kernel,
        out_shape=jax.ShapeDtypeStruct((OUT_PAD, b_pad), jnp.float32),
        grid=(b_pad // tb,),
        in_specs=in_specs,
        out_specs=batch_block(OUT_PAD),
        compiler_params=pltpu.CompilerParams(
            dimension_semantics=("parallel",)),
        cost_estimate=pl.CostEstimate(flops=flops, transcendentals=0,
                                      bytes_accessed=bytes_accessed),
    )(boards_t, tp, *weights)

    return out_t[:OUT_DIM, :B].T                                       # (B, 7)


def policy_forward_reference(boards, turn_players, p):
    """Pure-JAX f32 transcription of the PyTorch forward, for verification."""
    B = boards.shape[0]
    x = jnp.transpose(p["emb"][boards], (0, 3, 1, 2))                  # NCHW
    x = lax.conv_general_dilated(x, p["wc"], (1, 1), "VALID",
                                 dimension_numbers=("NCHW", "OIHW", "NCHW"))
    x = jnp.maximum(x + p["bc"].reshape(1, -1, 1, 1), 0.0).reshape(B, -1)
    pe = p["emb"][turn_players]                                        # (B, 2)
    x = jnp.concatenate([x, pe], axis=-1)                              # (B, 194)
    x = jnp.maximum(x @ p["w1"] + p["b1"], 0.0)
    x = jnp.maximum(x @ p["w2"] + p["b2"], 0.0)
    x = jnp.maximum(x @ p["w3"] + p["b3"], 0.0)
    return x @ p["wo"] + p["bo"]


if __name__ == "__main__":
    key = jax.random.PRNGKey(0)
    pkey, bkey, tkey, b2key, t2key = jax.random.split(key, 5)
    params = init_params(pkey)
    kparams = prepare_kernel_params(params)

    fwd = jax.jit(policy_forward_pallas, static_argnames=("block_b",))

    # bf16 weights on the MXU -> tolerance relaxed vs the pure-f32 reference.
    ATOL = RTOL = 2e-2

    # Small batch: exercises the padding path, single grid step.
    B = 8
    boards = jax.random.randint(bkey, (B, BOARD_H, BOARD_W), 0, PLAYER_DIM,
                                dtype=jnp.int32)
    turn_players = jax.random.randint(tkey, (B,), 1, PLAYER_DIM, dtype=jnp.int32)
    out = jax.block_until_ready(fwd(boards, turn_players, kparams))
    ref = policy_forward_reference(boards, turn_players, params)
    assert out.shape == (B, OUT_DIM)
    assert jnp.allclose(out, ref, atol=ATOL, rtol=RTOL), \
        float(jnp.max(jnp.abs(out - ref)))

    # Larger batch with a 128-lane tile: exercises grid > 1 with resident weights.
    B2 = 300
    boards2 = jax.random.randint(b2key, (B2, BOARD_H, BOARD_W), 0, PLAYER_DIM,
                                 dtype=jnp.int32)
    turn2 = jax.random.randint(t2key, (B2,), 1, PLAYER_DIM, dtype=jnp.int32)
    out2 = jax.block_until_ready(fwd(boards2, turn2, kparams, block_b=128))
    ref2 = policy_forward_reference(boards2, turn2, params)
    assert out2.shape == (B2, OUT_DIM)
    assert jnp.allclose(out2, ref2, atol=ATOL, rtol=RTOL), \
        float(jnp.max(jnp.abs(out2 - ref2)))

    print("KERNEL_OK")
</pallas_src>

<mosaic_0001>
module attributes {stable_mosaic.version = 11 : i64} {
  func.func @policy_kernel(%arg0: i32, %arg1: memref<48x128xi32, #tpu.memory_space<vmem>>, %arg2: memref<1x128xi32, #tpu.memory_space<vmem>>, %arg3: memref<192x96xbf16, #tpu.memory_space<vmem>>, %arg4: memref<192x1xf32, #tpu.memory_space<vmem>>, %arg5: memref<64x192xbf16, #tpu.memory_space<vmem>>, %arg6: memref<64x3xf32, #tpu.memory_space<vmem>>, %arg7: memref<64x1xf32, #tpu.memory_space<vmem>>, %arg8: memref<32x64xbf16, #tpu.memory_space<vmem>>, %arg9: memref<32x1xf32, #tpu.memory_space<vmem>>, %arg10: memref<16x32xbf16, #tpu.memory_space<vmem>>, %arg11: memref<16x1xf32, #tpu.memory_space<vmem>>, %arg12: memref<8x16xbf16, #tpu.memory_space<vmem>>, %arg13: memref<8x1xf32, #tpu.memory_space<vmem>>, %arg14: memref<8x128xf32, #tpu.memory_space<vmem>>) attributes {dimension_semantics = [#tpu.dimension_semantics<parallel>], iteration_bounds = array<i64: 1>, scalar_prefetch = 0 : i64, scratch_operands = 0 : i64, tpu.core_type = #tpu.core_type<tc>, window_params = [{transform_indices = @transform_0, window_bounds = array<i64: 48, 128>}, {transform_indices = @transform_1, window_bounds = array<i64: 1, 128>}, {pipeline_mode = #tpu.pipeline_mode<synchronous>, transform_indices = @transform_2, window_bounds = array<i64: 192, 96>}, {pipeline_mode = #tpu.pipeline_mode<synchronous>, transform_indices = @transform_3, window_bounds = array<i64: 192, 1>}, {pipeline_mode = #tpu.pipeline_mode<synchronous>, transform_indices = @transform_4, window_bounds = array<i64: 64, 192>}, {pipeline_mode = #tpu.pipeline_mode<synchronous>, transform_indices = @transform_5, window_bounds = array<i64: 64, 3>}, {pipeline_mode = #tpu.pipeline_mode<synchronous>, transform_indices = @transform_6, window_bounds = array<i64: 64, 1>}, {pipeline_mode = #tpu.pipeline_mode<synchronous>, transform_indices = @transform_7, window_bounds = array<i64: 32, 64>}, {pipeline_mode = #tpu.pipeline_mode<synchronous>, transform_indices = @transform_8, window_bounds = array<i64: 32, 1>}, {pipeline_mode = #tpu.pipeline_mode<synchronous>, transform_indices = @transform_9, window_bounds = array<i64: 16, 32>}, {pipeline_mode = #tpu.pipeline_mode<synchronous>, transform_indices = @transform_10, window_bounds = array<i64: 16, 1>}, {pipeline_mode = #tpu.pipeline_mode<synchronous>, transform_indices = @transform_11, window_bounds = array<i64: 8, 16>}, {pipeline_mode = #tpu.pipeline_mode<synchronous>, transform_indices = @transform_12, window_bounds = array<i64: 8, 1>}, {transform_indices = @transform_13, window_bounds = array<i64: 8, 128>}]} {
    %c0 = arith.constant 0 : index
    %c0_0 = arith.constant 0 : index
    %0 = vector.load %arg1[%c0, %c0_0] : memref<48x128xi32, #tpu.memory_space<vmem>>, vector<48x128xi32>
    %c1_i32 = arith.constant 1 : i32
    %1 = vector.broadcast %c1_i32 : i32 to vector<48x128xi32>
    %2 = arith.cmpi eq, %0, %1 : vector<48x128xi32>
    %3 = arith.extui %2 : vector<48x128xi1> to vector<48x128xi32>
    %4 = arith.sitofp %3 : vector<48x128xi32> to vector<48x128xf32>
    %5 = arith.truncf %4 : vector<48x128xf32> to vector<48x128xbf16>
    %c2_i32 = arith.constant 2 : i32
    %6 = vector.broadcast %c2_i32 : i32 to vector<48x128xi32>
    %7 = arith.cmpi eq, %0, %6 : vector<48x128xi32>
    %8 = arith.extui %7 : vector<48x128xi1> to vector<48x128xi32>
    %9 = arith.sitofp %8 : vector<48x128xi32> to vector<48x128xf32>
    %10 = arith.truncf %9 : vector<48x128xf32> to vector<48x128xbf16>
    %11 = tpu.concatenate %5, %10 in 0 : vector<48x128xbf16>, vector<48x128xbf16> -> vector<96x128xbf16>
    %c0_1 = arith.constant 0 : index
    %c0_2 = arith.constant 0 : index
    %12 = vector.load %arg3[%c0_1, %c0_2] : memref<192x96xbf16, #tpu.memory_space<vmem>>, vector<192x96xbf16>
    %cst = arith.constant dense<0.000000e+00> : vector<192x128xf32>
    %13 = tpu.matmul %12, %11, %cst {dimension_numbers = #tpu.dot_dimension_numbers<[1], [0], [0], [1], [0, 0, 1, 1], [], []>} : vector<192x96xbf16>, vector<96x128xbf16>, vector<192x128xf32> -> vector<192x128xf32>
    %c0_3 = arith.constant 0 : index
    %c0_4 = arith.constant 0 : index
    %14 = vector.load %arg4[%c0_3, %c0_4] : memref<192x1xf32, #tpu.memory_space<vmem>>, vector<192x1xf32>
    %15 = vector.broadcast %14 : vector<192x1xf32> to vector<192x128xf32>
    %16 = arith.addf %13, %15 : vector<192x128xf32>
    %cst_5 = arith.constant 0.000000e+00 : f32
    %17 = vector.broadcast %cst_5 : f32 to vector<192x128xf32>
    %18 = arith.maximumf %16, %17 : vector<192x128xf32>
    %19 = arith.truncf %18 : vector<192x128xf32> to vector<192x128xbf16>
    %c0_6 = arith.constant 0 : index
    %c0_7 = arith.constant 0 : index
    %20 = vector.load %arg2[%c0_6, %c0_7] : memref<1x128xi32, #tpu.memory_space<vmem>>, vector<1x128xi32>
    %c0_8 = arith.constant 0 : index
    %c0_9 = arith.constant 0 : index
    %21 = vector.load %arg6[%c0_8, %c0_9] : memref<64x3xf32, #tpu.memory_space<vmem>>, vector<64x3xf32>
    %c0_10 = arith.constant 0 : index
    %c0_11 = arith.constant 0 : index
    %22 = vector.load %arg5[%c0_10, %c0_11] : memref<64x192xbf16, #tpu.memory_space<vmem>>, vector<64x192xbf16>
    %cst_12 = arith.constant dense<0.000000e+00> : vector<64x128xf32>
    %23 = tpu.matmul %22, %19, %cst_12 {dimension_numbers = #tpu.dot_dimension_numbers<[1], [0], [0], [1], [0, 0, 1, 1], [], []>} : vector<64x192xbf16>, vector<192x128xbf16>, vector<64x128xf32> -> vector<64x128xf32>
    %c0_13 = arith.constant 0 : index
    %c0_14 = arith.constant 0 : index
    %24 = vector.load %arg7[%c0_13, %c0_14] : memref<64x1xf32, #tpu.memory_space<vmem>>, vector<64x1xf32>
    %25 = vector.broadcast %24 : vector<64x1xf32> to vector<64x128xf32>
    %26 = arith.addf %23, %25 : vector<64x128xf32>
    %27 = vector.extract_strided_slice %21 {offsets = [0, 0], sizes = [64, 1], strides = [1, 1]} : vector<64x3xf32> to vector<64x1xf32>
    %c0_i32 = arith.constant 0 : i32
    %28 = vector.broadcast %c0_i32 : i32 to vector<1x128xi32>
    %29 = arith.cmpi eq, %20, %28 : vector<1x128xi32>
    %30 = arith.extui %29 : vector<1x128xi1> to vector<1x128xi32>
    %31 = arith.sitofp %30 : vector<1x128xi32> to vector<1x128xf32>
    %32 = vector.broadcast %27 : vector<64x1xf32> to vector<64x128xf32>
    %33 = vector.broadcast %31 : vector<1x128xf32> to vector<64x128xf32>
    %34 = arith.mulf %32, %33 : vector<64x128xf32>
    %35 = arith.addf %26, %34 : vector<64x128xf32>
    %36 = vector.extract_strided_slice %21 {offsets = [0, 1], sizes = [64, 1], strides = [1, 1]} : vector<64x3xf32> to vector<64x1xf32>
    %c1_i32_15 = arith.constant 1 : i32
    %37 = vector.broadcast %c1_i32_15 : i32 to vector<1x128xi32>
    %38 = arith.cmpi eq, %20, %37 : vector<1x128xi32>
    %39 = arith.extui %38 : vector<1x128xi1> to vector<1x128xi32>
    %40 = arith.sitofp %39 : vector<1x128xi32> to vector<1x128xf32>
    %41 = vector.broadcast %36 : vector<64x1xf32> to vector<64x128xf32>
    %42 = vector.broadcast %40 : vector<1x128xf32> to vector<64x128xf32>
    %43 = arith.mulf %41, %42 : vector<64x128xf32>
    %44 = arith.addf %35, %43 : vector<64x128xf32>
    %45 = vector.extract_strided_slice %21 {offsets = [0, 2], sizes = [64, 1], strides = [1, 1]} : vector<64x3xf32> to vector<64x1xf32>
    %c2_i32_16 = arith.constant 2 : i32
    %46 = vector.broadcast %c2_i32_16 : i32 to vector<1x128xi32>
    %47 = arith.cmpi eq, %20, %46 : vector<1x128xi32>
    %48 = arith.extui %47 : vector<1x128xi1> to vector<1x128xi32>
    %49 = arith.sitofp %48 : vector<1x128xi32> to vector<1x128xf32>
    %50 = vector.broadcast %45 : vector<64x1xf32> to vector<64x128xf32>
    %51 = vector.broadcast %49 : vector<1x128xf32> to vector<64x128xf32>
    %52 = arith.mulf %50, %51 : vector<64x128xf32>
    %53 = arith.addf %44, %52 : vector<64x128xf32>
    %cst_17 = arith.constant 0.000000e+00 : f32
    %54 = vector.broadcast %cst_17 : f32 to vector<64x128xf32>
    %55 = arith.maximumf %53, %54 : vector<64x128xf32>
    %56 = arith.truncf %55 : vector<64x128xf32> to vector<64x128xbf16>
    %c0_18 = arith.constant 0 : index
    %c0_19 = arith.constant 0 : index
    %57 = vector.load %arg8[%c0_18, %c0_19] : memref<32x64xbf16, #tpu.memory_space<vmem>>, vector<32x64xbf16>
    %cst_20 = arith.constant dense<0.000000e+00> : vector<32x128xf32>
    %58 = tpu.matmul %57, %56, %cst_20 {dimension_numbers = #tpu.dot_dimension_numbers<[1], [0], [0], [1], [0, 0, 1, 1], [], []>} : vector<32x64xbf16>, vector<64x128xbf16>, vector<32x128xf32> -> vector<32x128xf32>
    %c0_21 = arith.constant 0 : index
    %c0_22 = arith.constant 0 : index
    %59 = vector.load %arg9[%c0_21, %c0_22] : memref<32x1xf32, #tpu.memory_space<vmem>>, vector<32x1xf32>
    %60 = vector.broadcast %59 : vector<32x1xf32> to vector<32x128xf32>
    %61 = arith.addf %58, %60 : vector<32x128xf32>
    %cst_23 = arith.constant 0.000000e+00 : f32
    %62 = vector.broadcast %cst_23 : f32 to vector<32x128xf32>
    %63 = arith.maximumf %61, %62 : vector<32x128xf32>
    %64 = arith.truncf %63 : vector<32x128xf32> to vector<32x128xbf16>
    %c0_24 = arith.constant 0 : index
    %c0_25 = arith.constant 0 : index
    %65 = vector.load %arg10[%c0_24, %c0_25] : memref<16x32xbf16, #tpu.memory_space<vmem>>, vector<16x32xbf16>
    %cst_26 = arith.constant dense<0.000000e+00> : vector<16x128xf32>
    %66 = tpu.matmul %65, %64, %cst_26 {dimension_numbers = #tpu.dot_dimension_numbers<[1], [0], [0], [1], [0, 0, 1, 1], [], []>} : vector<16x32xbf16>, vector<32x128xbf16>, vector<16x128xf32> -> vector<16x128xf32>
    %c0_27 = arith.constant 0 : index
    %c0_28 = arith.constant 0 : index
    %67 = vector.load %arg11[%c0_27, %c0_28] : memref<16x1xf32, #tpu.memory_space<vmem>>, vector<16x1xf32>
    %68 = vector.broadcast %67 : vector<16x1xf32> to vector<16x128xf32>
    %69 = arith.addf %66, %68 : vector<16x128xf32>
    %cst_29 = arith.constant 0.000000e+00 : f32
    %70 = vector.broadcast %cst_29 : f32 to vector<16x128xf32>
    %71 = arith.maximumf %69, %70 : vector<16x128xf32>
    %72 = arith.truncf %71 : vector<16x128xf32> to vector<16x128xbf16>
    %c0_30 = arith.constant 0 : index
    %c0_31 = arith.constant 0 : index
    %73 = vector.load %arg12[%c0_30, %c0_31] : memref<8x16xbf16, #tpu.memory_space<vmem>>, vector<8x16xbf16>
    %cst_32 = arith.constant dense<0.000000e+00> : vector<8x128xf32>
    %74 = tpu.matmul %73, %72, %cst_32 {dimension_numbers = #tpu.dot_dimension_numbers<[1], [0], [0], [1], [0, 0, 1, 1], [], []>} : vector<8x16xbf16>, vector<16x128xbf16>, vector<8x128xf32> -> vector<8x128xf32>
    %c0_33 = arith.constant 0 : index
    %c0_34 = arith.constant 0 : index
    %75 = vector.load %arg13[%c0_33, %c0_34] : memref<8x1xf32, #tpu.memory_space<vmem>>, vector<8x1xf32>
    %76 = vector.broadcast %75 : vector<8x1xf32> to vector<8x128xf32>
    %77 = arith.addf %74, %76 : vector<8x128xf32>
    %c0_35 = arith.constant 0 : index
    %c0_36 = arith.constant 0 : index
    %78 = vector.load %arg14[%c0_35, %c0_36] : memref<8x128xf32, #tpu.memory_space<vmem>>, vector<8x128xf32>
    tpu.vector_store %arg14[%c0_35, %c0_36], %77 {strides = array<i32>} : memref<8x128xf32, #tpu.memory_space<vmem>>, vector<8x128xf32>,
    return
  }
  func.func @transform_0(%arg0: i32) -> (i32, i32) {
    %c0_i32 = arith.constant 0 : i32
    %c0_i32_0 = arith.constant 0 : i32
    return %c0_i32, %arg0 : i32, i32
  }
  func.func @transform_1(%arg0: i32) -> (i32, i32) {
    %c0_i32 = arith.constant 0 : i32
    %c0_i32_0 = arith.constant 0 : i32
    return %c0_i32, %arg0 : i32, i32
  }
  func.func @transform_2(%arg0: i32) -> (i32, i32) {
    %c0_i32 = arith.constant 0 : i32
    %c0_i32_0 = arith.constant 0 : i32
    %c0_i32_1 = arith.constant 0 : i32
    return %c0_i32, %c0_i32_0 : i32, i32
  }
  func.func @transform_3(%arg0: i32) -> (i32, i32) {
    %c0_i32 = arith.constant 0 : i32
    %c0_i32_0 = arith.constant 0 : i32
    %c0_i32_1 = arith.constant 0 : i32
    return %c0_i32, %c0_i32_0 : i32, i32
  }
  func.func @transform_4(%arg0: i32) -> (i32, i32) {
    %c0_i32 = arith.constant 0 : i32
    %c0_i32_0 = arith.constant 0 : i32
    %c0_i32_1 = arith.constant 0 : i32
    return %c0_i32, %c0_i32_0 : i32, i32
  }
  func.func @transform_5(%arg0: i32) -> (i32, i32) {
    %c0_i32 = arith.constant 0 : i32
    %c0_i32_0 = arith.constant 0 : i32
    %c0_i32_1 = arith.constant 0 : i32
    return %c0_i32, %c0_i32_0 : i32, i32
  }
  func.func @transform_6(%arg0: i32) -> (i32, i32) {
    %c0_i32 = arith.constant 0 : i32
    %c0_i32_0 = arith.constant 0 : i32
    %c0_i32_1 = arith.constant 0 : i32
    return %c0_i32, %c0_i32_0 : i32, i32
  }
  func.func @transform_7(%arg0: i32) -> (i32, i32) {
    %c0_i32 = arith.constant 0 : i32
    %c0_i32_0 = arith.constant 0 : i32
    %c0_i32_1 = arith.constant 0 : i32
    return %c0_i32, %c0_i32_0 : i32, i32
  }
  func.func @transform_8(%arg0: i32) -> (i32, i32) {
    %c0_i32 = arith.constant 0 : i32
    %c0_i32_0 = arith.constant 0 : i32
    %c0_i32_1 = arith.constant 0 : i32
    return %c0_i32, %c0_i32_0 : i32, i32
  }
  func.func @transform_9(%arg0: i32) -> (i32, i32) {
    %c0_i32 = arith.constant 0 : i32
    %c0_i32_0 = arith.constant 0 : i32
    %c0_i32_1 = arith.constant 0 : i32
    return %c0_i32, %c0_i32_0 : i32, i32
  }
  func.func @transform_10(%arg0: i32) -> (i32, i32) {
    %c0_i32 = arith.constant 0 : i32
    %c0_i32_0 = arith.constant 0 : i32
    %c0_i32_1 = arith.constant 0 : i32
    return %c0_i32, %c0_i32_0 : i32, i32
  }
  func.func @transform_11(%arg0: i32) -> (i32, i32) {
    %c0_i32 = arith.constant 0 : i32
    %c0_i32_0 = arith.constant 0 : i32
    %c0_i32_1 = arith.constant 0 : i32
    return %c0_i32, %c0_i32_0 : i32, i32
  }
  func.func @transform_12(%arg0: i32) -> (i32, i32) {
    %c0_i32 = arith.constant 0 : i32
    %c0_i32_0 = arith.constant 0 : i32
    %c0_i32_1 = arith.constant 0 : i32
    return %c0_i32, %c0_i32_0 : i32, i32
  }
  func.func @transform_13(%arg0: i32) -> (i32, i32) {
    %c0_i32 = arith.constant 0 : i32
    %c0_i32_0 = arith.constant 0 : i32
    return %c0_i32, %arg0 : i32, i32
  }
}

</mosaic_0001>

<bundles_post_ra>
// kernel: policy_forward_pallas.1
= control target key start
LH: loop header
LB: loop body
LE: loop exit
PB: predicated region body
PF: predicated region fallthrough
CT: control target
= control target key end

     0   :  { %v1327_v3 = vmov 0   ;;  %vm321_vm2 = vcmask 785408   ;;  %v1328_v8 = vmov 1.0|1.0   ;;  %v1329_v46 = vmov 1   ;;  %s1756_s0 = inlined_call_operand.vmem [shape: s32[48,128], index: 0, kind: input, shape index: {}]   ;;  %s1757_s2 = inlined_call_operand.vmem [shape: bf16[192,96], index: 2, kind: input, shape index: {}]   ;;  %s1758_s3 = inlined_call_operand.vmem [shape: f32[192,1], index: 3, kind: input, shape index: {}]   ;;  %s1759_s6 = inlined_call_operand.vmem [shape: f32[64,1], index: 6, kind: input, shape index: {}]   ;;  %s1760_s5 = inlined_call_operand.vmem [shape: f32[64,3], index: 5, kind: input, shape index: {}]   ;;  %s1761_s4 = inlined_call_operand.vmem [shape: bf16[64,192], index: 4, kind: input, shape index: {}]   ;;  %s1762_s7 = inlined_call_operand.vmem [shape: bf16[32,64], index: 7, kind: input, shape index: {}]   ;;  %s1763_s8 = inlined_call_operand.vmem [shape: f32[32,1], index: 8, kind: input, shape index: {}]   ;;  %s1764_s10 = inlined_call_operand.vmem [shape: f32[16,1], index: 10, kind: input, shape index: {}]   ;;  %s1765_s12 = inlined_call_operand.vmem [shape: f32[8,1], index: 12, kind: input, shape index: {}]   ;;  %s1766_s1 = inlined_call_operand.vmem [shape: s32[1,128], index: 1, kind: input, shape index: {}]   ;;  %s1767_s9 = inlined_call_operand.vmem [shape: bf16[16,32], index: 9, kind: input, shape index: {}]   ;;  %s1768_s11 = inlined_call_operand.vmem [shape: bf16[8,16], index: 11, kind: input, shape index: {}]   ;;  %s1769_s13 = inlined_call_operand.vmem [shape: f32[8,128], index: 13, kind: output, shape index: {}]  }
   0x1   :  { %v49_v0 = vld [vmem:[%s1756_s0 + $0x20] sm:$0xff]  ;;  %v50_v1 = vld [vmem:[%s1756_s0 + $0x28] sm:$0xff]  ;;  %v47_v2 = vld [vmem:[%s1756_s0 + $0x10] sm:$0xff]  ;;  %1282 = vset.pattern.permute.xlu0 %v1327_v3  ;;  %1283 = vset.pattern.permute.xlu1 %v1327_v3  ;;  %v1330_v51 = vmov 2  }
   0x2   :  { %vm76_vm0 = vcmp.eq.s32.totalorder %v49_v0, 2  ;;  %vm77_vm1 = vcmp.eq.s32.totalorder %v50_v1, 2  ;;  %v48_v4 = vld [vmem:[%s1756_s0 + $0x18] sm:$0xff]  ;;  %v45_v5 = vld [vmem:[%s1756_s0] sm:$0xff]  ;;  %637 = vmatprep.subr.bf16.mxu1 %v1327_v3  ;;  %vm74_vm4 = vcmp.eq.s32.totalorder %v47_v2, 2  ;;  %v46_v6 = vld [vmem:[%s1756_s0 + $0x8] sm:$0xff] }
   0x3   :  { %vm1139_vm3 = vmpackc.low %vm77_vm1, %vm76_vm0  ;;  %vm75_vm5 = vcmp.eq.s32.totalorder %v48_v4, 2  ;;  %v1300_v7 = vld [vmem:[%s1757_s2] sm:$0xff]   ;;  %vm72_vm7 = vcmp.eq.s32.totalorder %v45_v5, 2  ;;  %vm73_vm8 = vcmp.eq.s32.totalorder %v46_v6, 2  ;;  %vm55_vm10 = vcmp.eq.s32.totalorder %v49_v0, 1  ;;  %v131_v9 = vld [vmem:[%s1758_s3 + $0x70] sm:$0xff] }
   0x4   :  { %1214 = vmatprep.subr.msk.bf16.mxu0 %vm1139_vm3, %v1328_v8  ;;  %vm1141_vm6 = vmpackc.low %vm75_vm5, %vm74_vm4  ;;  %1226 = vmatprep.mubr.msk.bf16.mxu0 %vm321_vm2, %v1300_v7  ;;  %vm56_vm11 = vcmp.eq.s32.totalorder %v50_v1, 1  ;;  %vm53_vm13 = vcmp.eq.s32.totalorder %v47_v2, 1  ;;  %vm54_vm14 = vcmp.eq.s32.totalorder %v48_v4, 1  ;;  %vm51_vm0 = vcmp.eq.s32.totalorder %v45_v5, 1  ;;  %v129_v10 = vld [vmem:[%s1758_s3 + $0x60] sm:$0xff]  ;;  %v132_v11 = vld [vmem:[%s1758_s3 + $0x78] sm:$0xff] }
   0x5   :  { %1215 = vmatpush3.bf16.msk.msra.mxu0 %vm1139_vm3, %v1328_v8  ;;  %vm1143_vm9 = vmpackc.low %vm73_vm8, %vm72_vm7  ;;  %vm52_vm1 = vcmp.eq.s32.totalorder %v46_v6, 1  ;;  %213 = vperm.xlu0 %1282, %v131_v9   ;;  %v130_v12 = vld [vmem:[%s1758_s3 + $0x68] sm:$0xff]  ;;  %v127_v13 = vld [vmem:[%s1758_s3 + $0x50] sm:$0xff]  ;;  %vm624_vm4 = vcmask 523264   ;;  %vm1332_vm7 = vmmov 0   ;;  %vm1011_vm8 = vcmask 261120  }
   0x6   :  { %1216 = vmatprep.subr.msk.bf16.mxu0 %vm1141_vm6, %v1328_v8  ;;  %vm1145_vm12 = vmpackc.low %vm56_vm11, %vm55_vm10  ;;  %203 = vperm.xlu1 %1283, %v129_v10   ;;  %v1301_v14 = vld [vmem:[%s1757_s2 + $0x8] sm:$0xff]   ;;  %v128_v15 = vld [vmem:[%s1758_s3 + $0x58] sm:$0xff] }
   0x7   :  { %vm1147_vm15 = vmpackc.low %vm54_vm14, %vm53_vm13  ;;  %v1302_v16 = vld [vmem:[%s1757_s2 + $0x10] sm:$0xff]   ;;  %v125_v17 = vld [vmem:[%s1758_s3 + $0x40] sm:$0xff] }
   0x8   :  { %vm1149_vm3 = vmpackc.low %vm52_vm1, %vm51_vm0  ;;  %v126_v18 = vld [vmem:[%s1758_s3 + $0x48] sm:$0xff]  ;;  %v123_v19 = vld [vmem:[%s1758_s3 + $0x30] sm:$0xff] }
   0x9   :  { %1217 = vmatpush3.bf16.msk.msra.mxu0 %vm1141_vm6, %v1328_v8  ;;  %218 = vperm.xlu0 %1282, %v132_v11   ;;  %v1303_v20 = vld [vmem:[%s1757_s2 + $0x18] sm:$0xff]   ;;  %v1304_v22 = vld [vmem:[%s1757_s2 + $0x20] sm:$0xff]   ;;  %v122_v24 = vld [vmem:[%s1758_s3 + $0x28] sm:$0xff] }
   0xa   :  { %1218 = vmatprep.subr.msk.bf16.mxu0 %vm1143_vm9, %v1328_v8  ;;  %208 = vperm.xlu1 %1283, %v130_v12   ;;  %v124_v21 = vld [vmem:[%s1758_s3 + $0x38] sm:$0xff]  ;;  %v121_v23 = vld [vmem:[%s1758_s3 + $0x20] sm:$0xff]  ;;  %v119_v25 = vld [vmem:[%s1758_s3 + $0x10] sm:$0xff] }
   0xb   :  { %v1305_v26 = vld [vmem:[%s1757_s2 + $0x28] sm:$0xff]   ;;  %v120_v27 = vld [vmem:[%s1758_s3 + $0x18] sm:$0xff]  ;;  %v1306_v28 = vld [vmem:[%s1757_s2 + $0x30] sm:$0xff]  }
   0xc   :  { %v117_v29 = vld [vmem:[%s1758_s3] sm:$0xff]  ;;  %v118_v30 = vld [vmem:[%s1758_s3 + $0x8] sm:$0xff]  ;;  %v139_v31 = vld [vmem:[%s1758_s3 + $0xb0] sm:$0xff] }
   0xd   :  { %1219 = vmatpush3.bf16.msk.msra.mxu0 %vm1143_vm9, %v1328_v8  ;;  %193 = vperm.xlu0 %1282, %v127_v13   ;;  %v1307_v32 = vld [vmem:[%s1757_s2 + $0x38] sm:$0xff]   ;;  %v1308_v34 = vld [vmem:[%s1757_s2 + $0x40] sm:$0xff]   ;;  %v138_v36 = vld [vmem:[%s1758_s3 + $0xa8] sm:$0xff]  ;;  %vm1066_vm9 = vcmask 130048  }
   0xe   :  { %1220 = vmatprep.subr.msk.bf16.mxu0 %vm1145_vm12, %v1328_v8  ;;  %198 = vperm.xlu1 %1283, %v128_v15   ;;  %v140_v33 = vld [vmem:[%s1758_s3 + $0xb8] sm:$0xff]  ;;  %v137_v35 = vld [vmem:[%s1758_s3 + $0xa0] sm:$0xff]  ;;  %v135_v37 = vld [vmem:[%s1758_s3 + $0x90] sm:$0xff] }
   0xf   :  { %v1309_v38 = vld [vmem:[%s1757_s2 + $0x48] sm:$0xff]   ;;  %v136_v39 = vld [vmem:[%s1758_s3 + $0x98] sm:$0xff]  ;;  %v1310_v40 = vld [vmem:[%s1757_s2 + $0x50] sm:$0xff]  }
  0x10   :  { %v133_v41 = vld [vmem:[%s1758_s3 + $0x80] sm:$0xff]  ;;  %v134_v42 = vld [vmem:[%s1758_s3 + $0x88] sm:$0xff]  ;;  %v1311_v43 = vld [vmem:[%s1757_s2 + $0x58] sm:$0xff]  }
  0x11   :  { %1221 = vmatpush3.bf16.msk.msra.mxu0 %vm1145_vm12, %v1328_v8  ;;  %183 = vperm.xlu0 %1282, %v125_v17   ;;  %v547_v44 = vld [vmem:[%s1759_s6 + $0x38] sm:$0xff]  ;;  %v1314_v47 = vld [vmem:[%s1761_s4 + $0x4] ss:$8 sps:$4 sm:$0xff]   ;;  %v542_v52 = vld [vmem:[%s1759_s6 + $0x10] sm:$0xff] }
  0x12   :  { %1222 = vmatprep.subr.msk.bf16.mxu0 %vm1147_vm15, %v1328_v8  ;;  %188 = vperm.xlu1 %1283, %v126_v18   ;;  %v531_v45 = vld [vmem:[%s1760_s5 + $0x38] sm:$0xff]  ;;  %v544_v48 = vld [vmem:[%s1759_s6 + $0x20] sm:$0xff]  ;;  %v529_v50 = vld [vmem:[%s1760_s5 + $0x28] sm:$0xff] }
  0x13   :  { %1171 = vmatprep.mubr.msk.bf16.mxu1 %vm624_vm4, %v1314_v47  ;;  %v528_v49 = vld [vmem:[%s1760_s5 + $0x20] sm:$0xff]  ;;  %v530_v53 = vld [vmem:[%s1760_s5 + $0x30] sm:$0xff]  ;;  %v543_v54 = vld [vmem:[%s1759_s6 + $0x18] sm:$0xff] }
  0x14   :  { %v546_v55 = vld [vmem:[%s1759_s6 + $0x30] sm:$0xff]  ;;  %v527_v56 = vld [vmem:[%s1760_s5 + $0x18] sm:$0xff]  ;;  %v545_v57 = vld [vmem:[%s1759_s6 + $0x28] sm:$0xff] }
  0x15   :  { %1223 = vmatpush3.bf16.msk.msra.mxu0 %vm1147_vm15, %v1328_v8  ;;  %173 = vperm.xlu0 %1282, %v123_v19   ;;  %v526_v58 = vld [vmem:[%s1760_s5 + $0x10] sm:$0xff]  ;;  %v540_v60 = vld [vmem:[%s1759_s6] sm:$0xff]  ;;  %v541_v0 = vld [vmem:[%s1759_s6 + $0x8] sm:$0xff] }
  0x16   :  { %1224 = vmatprep.subr.msk.bf16.mxu0 %vm1149_vm3, %v1328_v8  ;;  %178 = vperm.xlu1 %1283, %v124_v21   ;;  %v525_v1 = vld [vmem:[%s1760_s5 + $0x8] sm:$0xff]  ;;  %v524_v7 = vld [vmem:[%s1760_s5] sm:$0xff] }
  0x19   :  { %1225 = vmatpush3.bf16.msk.msra.mxu0 %vm1149_vm3, %v1328_v8  ;;  %163 = vperm.xlu0 %1282, %v121_v23  }
  0x1a   :  { %168 = vperm.xlu1 %1283, %v122_v24  }
  0x1c   :  { %1227 = vmatmul.mubr.msk.bf16.vlgmr.msra.gmra.mxu0 %vm321_vm2, %v1301_v14 }
  0x1d   :  { %1230 = vmatprep.mubr.msk.bf16.mxu0 %vm321_vm2, %v1302_v16  ;;  %153 = vperm.xlu0 %1282, %v119_v25  }
  0x1e   :  { %158 = vperm.xlu1 %1283, %v120_v27  }
  0x21   :  { %143 = vperm.xlu0 %1282, %v117_v29  }
  0x22   :  { %148 = vperm.xlu1 %1283, %v118_v30  }
  0x24   :  { %1231 = vmatmul.mubr.msk.bf16.gmra.mxu0 %vm321_vm2, %v1303_v20 }
  0x25   :  { %1234 = vmatprep.mubr.msk.bf16.mxu0 %vm321_vm2, %v1304_v22  ;;  %253 = vperm.xlu0 %1282, %v139_v31  }
  0x26   :  { %258 = vperm.xlu1 %1283, %v140_v33  }
  0x29   :  { %243 = vperm.xlu0 %1282, %v137_v35  }
  0x2a   :  { %248 = vperm.xlu1 %1283, %v138_v36  }
  0x2c   :  { %1235 = vmatmul.mubr.msk.bf16.gmra.mxu0 %vm321_vm2, %v1305_v26 }
  0x2d   :  { %1238 = vmatprep.mubr.msk.bf16.mxu0 %vm321_vm2, %v1306_v28  ;;  %233 = vperm.xlu0 %1282, %v135_v37  }
  0x2e   :  { %238 = vperm.xlu1 %1283, %v136_v39  }
  0x31   :  { %223 = vperm.xlu0 %1282, %v133_v41  }
  0x32   :  { %228 = vperm.xlu1 %1283, %v134_v42  }
  0x34   :  { %1239 = vmatmul.mubr.msk.bf16.gmra.mxu0 %vm321_vm2, %v1307_v32 }
  0x35   :  { %1242 = vmatprep.mubr.msk.bf16.mxu0 %vm321_vm2, %v1308_v34  ;;  %1284 = vset.pattern.permute.xlu0 %v1329_v46 }
  0x36   :  { %585 = vperm.xlu1 %1283, %v547_v44   ;;  %795 = vperm.xlu0 %1284, %v530_v53  }
  0x3a   :  { %742 = vperm.xlu1 %1283, %v531_v45   ;;  %791 = vperm.xlu0 %1284, %v529_v50  }
  0x3c   :  { %1243 = vmatmul.mubr.msk.bf16.gmra.mxu0 %vm321_vm2, %v1309_v38 }
  0x3d   :  { %1246 = vmatprep.mubr.msk.bf16.mxu0 %vm321_vm2, %v1310_v40 }
  0x3e   :  { %1285 = vset.pattern.permute.xlu1 %v1329_v46  ;;  %1289 = vset.pattern.permute.xlu0 %v1327_v3 }
  0x3f   :  { %799 = vperm.xlu1 %1285, %v531_v45   ;;  %580 = vperm.xlu0 %1289, %v546_v55  }
  0x43   :  { %1286 = vset.pattern.permute.xlu1 %v1327_v3  ;;  %737 = vperm.xlu0 %1289, %v530_v53  }
  0x44   :  { %1247 = vmatmul.mubr.msk.bf16.gmra.mxu0 %vm321_vm2, %v1311_v43  ;;  %570 = vperm.xlu1 %1286, %v544_v48  }
  0x47   :  { %575 = vperm.xlu0 %1289, %v545_v57  }
  0x48   :  { %727 = vperm.xlu1 %1286, %v528_v49  }
  0x4b   :  { %717 = vperm.xlu0 %1289, %v526_v58  }
  0x4c   :  { %732 = vperm.xlu1 %1286, %v529_v50  }
  0x4f   :  { %550 = vperm.xlu0 %1289, %v540_v60  }
  0x50   :  { %1287 = vset.pattern.permute.xlu1 %v1330_v51 }
  0x51   :  { %856 = vperm.xlu1 %1287, %v531_v45  }
  0x53   :  { %712 = vperm.xlu0 %1289, %v525_v1  }
  0x55   :  { %1288 = vset.pattern.permute.xlu1 %v1329_v46 }
  0x56   :  { %787 = vperm.xlu1 %1288, %v528_v49  }
  0x57   :  { %1294 = vset.pattern.permute.xlu0 %v1330_v51 }
  0x58   :  { %852 = vperm.xlu0 %1294, %v530_v53  }
  0x5a   :  { %1290 = vset.pattern.permute.xlu1 %v1327_v3 }
  0x5b   :  { %560 = vperm.xlu1 %1290, %v542_v52  }
  0x5c   :  { %848 = vperm.xlu0 %1294, %v529_v50  }
  0x5f   :  { %565 = vperm.xlu1 %1290, %v543_v54  }
  0x60   :  { %840 = vperm.xlu0 %1294, %v527_v56  }
  0x63   :  { %722 = vperm.xlu1 %1290, %v527_v56  }
  0x64   :  { %828 = vperm.xlu0 %1294, %v524_v7  }
  0x67   :  { %1291 = vset.pattern.permute.xlu1 %v1330_v51 }
  0x68   :  { %844 = vperm.xlu1 %1291, %v528_v49   ;;  %1298 = vset.pattern.permute.xlu0 %v1327_v3 }
  0x6c   :  { %1292 = vset.pattern.permute.xlu1 %v1329_v46 }
  0x6d   :  { %779 = vperm.xlu1 %1292, %v526_v58  }
  0x71   :  { %783 = vperm.xlu1 %1292, %v527_v56  }
  0x75   :  { %1293 = vset.pattern.permute.xlu1 %v1327_v3 }
  0x76   :  { %555 = vperm.xlu1 %1293, %v541_v0  }
  0x7a   :  { %707 = vperm.xlu1 %1293, %v524_v7  }
  0x7e   :  { %1295 = vset.pattern.permute.xlu1 %v1330_v51 }
  0x7f   :  { %836 = vperm.xlu1 %1295, %v526_v58  }
  0x80   :  { %v214_v2 = vpop.permute.xlu0 %213 }
  0x81   :  { %v204_v61 = vpop.permute.xlu1 %203 }
  0x83   :  { %1296 = vset.pattern.permute.xlu1 %v1329_v46 }
  0x84   :  { %v219_v9 = vpop.permute.xlu0 %218  ;;  %771 = vperm.xlu1 %1296, %v524_v7  }
  0x85   :  { %v209_v5 = vpop.permute.xlu1 %208 }
  0x88   :  { %v194_v14 = vpop.permute.xlu0 %193  ;;  %775 = vperm.xlu1 %1296, %v525_v1  }
  0x89   :  { %v199_v11 = vpop.permute.xlu1 %198 }
  0x8c   :  { %v184_v19 = vpop.permute.xlu0 %183  ;;  %1297 = vset.pattern.permute.xlu1 %v1330_v51 }
  0x8d   :  { %v189_v16 = vpop.permute.xlu1 %188  ;;  %832 = vperm.xlu1 %1297, %v525_v1  }
  0x90   :  { %v174_v26 = vpop.permute.xlu0 %173 }
  0x91   :  { %v179_v21 = vpop.permute.xlu1 %178  ;;  %1299 = vset.pattern.permute.xlu1 %v1327_v3 }
  0x94   :  { %v164_v40 = vpop.permute.xlu0 %163 }
  0x95   :  { %v169_v32 = vpop.permute.xlu1 %168 }
  0x98   :  { %v154_v51 = vpop.permute.xlu0 %153 }
  0x99   :  { %v159_v44 = vpop.permute.xlu1 %158 }
  0x9c   :  { %v144_v1 = vpop.permute.xlu0 %143 }
  0x9d   :  { %v149_v55 = vpop.permute.xlu1 %148 }
  0xa1   :  { %v259_v7 = vpop.permute.xlu1 %258 }
  0xdc   :  { %v1593_v59 = vpop.f32.mrf.mxu0 }
  0xde   :  { %v1598_v62 = vpop.f32.mrf.mxu0 }
  0xe0   :  { %v1600_v63 = vpop.f32.mrf.mxu0 }
  0xe2   :  { %v1608_v4 = vpop.f32.mrf.mxu0 }
  0xe4   :  { %v1611_v6 = vpop.f32.mrf.mxu0 }
  0xe5   :  { %v417_v53 = vadd.f32 %v1611_v6, %v174_v26 }
  0xe6   :  { %v1616_v8 = vpop.f32.mrf.mxu0 }
  0xe7   :  { %v409_v0 = vadd.f32 %v1616_v8, %v164_v40  ;;  %v396_v8 = vadd.f32 %v1608_v4, %v149_v55  ;;  %v900_v55 = vld [vmem:[%s1763_s8 + $0x18] sm:$0xff] }
  0xe8   :  { %v1233_v10 = vpop.f32.mrf.mxu0  ;;  %918 = vperm.xlu1 %1299, %v900_v55  }
  0xe9   :  { %v420_v48 = vadd.f32 %v1233_v10, %v179_v21  ;;  %v401_v10 = vadd.f32 %v1593_v59, %v154_v51  ;;  %v1323_v51 = vld [vmem:[%s1761_s4 + $0x30] ss:$8 sps:$4 sm:$0xff]  }
  0xea   :  { %v1619_v12 = vpop.f32.mrf.mxu0 }
  0xeb   :  { %v494_v56 = vmax.f32 %v420_v48, 0.0  ;;  %v412_v57 = vadd.f32 %v1619_v12, %v169_v32  ;;  %v254_v12 = vpop.permute.xlu0 %253  ;;  %v1318_v48 = vld [vmem:[%s1761_s4 + $0x24] ss:$8 sps:$4 sm:$0xff]  }
  0xec   :  { %v1236_v13 = vpop.f32.mrf.mxu0 }
  0xed   :  { %v433_v38 = vadd.f32 %v1236_v13, %v194_v14  ;;  %v492_v6 = vmax.f32 %v412_v57, 0.0 }
  0xee   :  { %v424_v15 = vpop.f32.mrf.mxu0 }
  0xef   :  { %v497_v46 = vmax.f32 %v433_v38, 0.0  ;;  %v425_v47 = vadd.f32 %v424_v15, %v184_v19  ;;  %v488_v19 = vmax.f32 %v396_v8, 0.0 }
  0xf0   :  { %v1237_v17 = vpop.f32.mrf.mxu0 }
  0xf1   :  { %v436_v34 = vadd.f32 %v1237_v17, %v199_v11  ;;  %v495_v54 = vmax.f32 %v425_v47, 0.0  ;;  %v491_v11 = vmax.f32 %v409_v0, 0.0  ;;  %v393_v17 = vadd.f32 %v1598_v62, %v144_v1  ;;  %v1315_v47 = vld [vmem:[%s1761_s4 + $0x14] ss:$8 sps:$4 sm:$0xff]   ;;  %v995_v0 = vld [vmem:[%s1764_s10 + $0x8] sm:$0xff] }
  0xf2   :  { %v427_v18 = vpop.f32.mrf.mxu0 }
  0xf3   :  { %v498_v41 = vmax.f32 %v436_v34, 0.0  ;;  %v428_v42 = vadd.f32 %v427_v18, %v189_v16  ;;  %v513_v14 = vpack.c.bf16 %v492_v6, %v491_v11  ;;  %v489_v16 = vmax.f32 %v401_v10, 0.0 }
  0xf4   :  { %v1240_v20 = vpop.f32.mrf.mxu0 }
  0xf5   :  { %v449_v23 = vadd.f32 %v1240_v20, %v214_v2  ;;  %v516_v49 = vpack.c.bf16 %v498_v41, %v497_v46  ;;  %v496_v50 = vmax.f32 %v428_v42, 0.0  ;;  %v404_v2 = vadd.f32 %v1600_v63, %v159_v44  ;;  %v249_v63 = vpop.permute.xlu1 %248  ;;  %v244_v20 = vpop.permute.xlu0 %243  ;;  %v1312_v46 = vld [vmem:[%s1761_s4] ss:$8 sps:$4 sm:$0xff]  }
  0xf6   :  { %v440_v22 = vpop.f32.mrf.mxu0 }
  0xf7   :  { %v501_v28 = vmax.f32 %v449_v23, 0.0  ;;  %v441_v29 = vadd.f32 %v440_v22, %v204_v61  ;;  %v515_v58 = vpack.c.bf16 %v496_v50, %v495_v54  ;;  %v493_v61 = vmax.f32 %v417_v53, 0.0  ;;  %v1321_v50 = vld [vmem:[%s1761_s4 + $0x34] ss:$8 sps:$4 sm:$0xff]   ;;  %v1324_v54 = vld [vmem:[%s1762_s7] sm:$0xff]  }
  0xf8   :  { %v1241_v24 = vpop.f32.mrf.mxu0  ;;  %v490_v13 = vmax.f32 %v404_v2, 0.0  ;;  %v487_v22 = vmax.f32 %v393_v17, 0.0  ;;  %1258 = vmatprep.mubr.msk.bf16.mxu0 %vm624_vm4, %v1324_v54  ;;  %v1060_v2 = vld [vmem:[%s1765_s12] sm:$0xff] }
  0xf9   :  { %v452_v25 = vadd.f32 %v1241_v24, %v219_v9  ;;  %v499_v39 = vmax.f32 %v441_v29, 0.0  ;;  %v239_v26 = vpop.permute.xlu1 %238 }
  0xfa   :  { %v443_v27 = vpop.f32.mrf.mxu0  ;;  %v512_v18 = vpack.c.bf16 %v490_v13, %v489_v16  ;;  %v511_v4 = vpack.c.bf16 %v488_v19, %v487_v22 }
  0xfb   :  { %v502_v30 = vmax.f32 %v452_v25, 0.0  ;;  %v444_v31 = vadd.f32 %v443_v27, %v209_v5  ;;  %v514_v5 = vpack.c.bf16 %v494_v56, %v493_v61  ;;  %v899_v56 = vld [vmem:[%s1763_s8 + $0x10] sm:$0xff]  ;;  %v994_v61 = vld [vmem:[%s1764_s10] sm:$0xff] }
  0xfc   :  { %v1625_v33 = vpop.f32.mrf.mxu0  ;;  %913 = vperm.xlu0 %1298, %v899_v56  }
  0xfd   :  { %v500_v35 = vmax.f32 %v444_v31, 0.0  ;;  %v518_v36 = vpack.c.bf16 %v502_v30, %v501_v28  ;;  %v234_v28 = vpop.permute.xlu0 %233 }
  0xfe   :  { %v1627_v37 = vpop.f32.mrf.mxu0  ;;  %v465_v32 = vadd.f32 %v1625_v33, %v234_v28 }
  0xff   :  { %638 = vmatpush1.bf16.msra.mxu1 %v518_v36  ;;  %v517_v43 = vpack.c.bf16 %v500_v35, %v499_v39  ;;  %v229_v35 = vpop.permute.xlu1 %228 }
 0x100   :  { %639 = vmatprep.subr.bf16.mxu1 %v1327_v3  ;;  %v1245_v45 = vpop.f32.mrf.mxu0  ;;  %v505_v41 = vmax.f32 %v465_v32, 0.0 }
 0x101   :  { %v468_v29 = vadd.f32 %v1245_v45, %v239_v26  ;;  %v224_v40 = vpop.permute.xlu0 %223 }
 0x102   :  { %v459_v52 = vpop.f32.mrf.mxu0  ;;  %v457_v42 = vadd.f32 %v1627_v37, %v224_v40  ;;  %v1331_v37 = vmov 0.0  }
 0x103   :  { %640 = vmatpush1.bf16.msra.mxu1 %v517_v43  ;;  %v506_v36 = vmax.f32 %v468_v29, 0.0  ;;  %v460_v38 = vadd.f32 %v459_v52, %v229_v35  ;;  %v1675_v52 = vpop.permute.xlu1 %585 }
 0x104   :  { %641 = vmatprep.subr.bf16.mxu1 %v1327_v3  ;;  %v1248_v60 = vpop.f32.mrf.mxu0  ;;  %v503_v45 = vmax.f32 %v457_v42, 0.0 }
 0x105   :  { %v481_v23 = vadd.f32 %v1248_v60, %v254_v12  ;;  %v520_v43 = vpack.c.bf16 %v506_v36, %v505_v41  ;;  %v504_v44 = vmax.f32 %v460_v38, 0.0  ;;  %v898_v60 = vld [vmem:[%s1763_s8 + $0x8] sm:$0xff]  ;;  %v796_v11 = vpop.permute.xlu0 %795 }
 0x106   :  { %v472_v9 = vpop.f32.mrf.mxu0  ;;  %908 = vperm.xlu0 %1298, %v898_v60  }
 0x107   :  { %642 = vmatpush1.bf16.msra.mxu1 %v516_v49  ;;  %v509_v27 = vmax.f32 %v481_v23, 0.0  ;;  %v473_v62 = vadd.f32 %v472_v9, %v244_v20  ;;  %v519_v33 = vpack.c.bf16 %v504_v44, %v503_v45  ;;  %v1320_v49 = vld [vmem:[%s1761_s4 + $0x20] ss:$8 sps:$4 sm:$0xff]   ;;  %v1677_v53 = vpop.permute.xlu1 %742 }
 0x108   :  { %643 = vmatprep.subr.bf16.mxu1 %v1327_v3  ;;  %v1249_v15 = vpop.f32.mrf.mxu0 }
 0x109   :  { %v484_v59 = vadd.f32 %v1249_v15, %v259_v7  ;;  %v507_v34 = vmax.f32 %v473_v62, 0.0  ;;  %v792_v13 = vpop.permute.xlu0 %791  ;;  %v523_v62 = vld [vmem:[%s1766_s1] sm:$0x1] }
 0x10a   :  { %v475_v21 = vpop.f32.mrf.mxu0  ;;  %1003 = vperm.xlu0 %1298, %v995_v0   ;;  %vm702_vm2 = vcmp.eq.s32.totalorder %v523_v62, 0  ;;  %vm767_vm5 = vcmp.eq.s32.totalorder %v523_v62, 1  ;;  %vm824_vm6 = vcmp.eq.s32.totalorder %v523_v62, 2 }
 0x10b   :  { %644 = vmatpush1.bf16.msra.mxu1 %v515_v58  ;;  %v510_v24 = vmax.f32 %v484_v59, 0.0  ;;  %v476_v25 = vadd.f32 %v475_v21, %v249_v63  ;;  %v1689_v57 = vpop.permute.xlu1 %799  ;;  %v897_v58 = vld [vmem:[%s1763_s8] sm:$0xff]  ;;  %v1175_v36 = vsel %vm702_vm2, 1.0, %v1331_v37  ;;  %v1176_v38 = vsel %vm767_vm5, 1.0, %v1331_v37 }
 0x10c   :  { %645 = vmatprep.subr.bf16.mxu1 %v1327_v3  ;;  %903 = vperm.xlu1 %1299, %v897_v58   ;;  %v1177_v44 = vsel %vm824_vm6, 1.0, %v1331_v37 }
 0x10d   :  { %v522_v30 = vpack.c.bf16 %v510_v24, %v509_v27  ;;  %v508_v31 = vmax.f32 %v476_v25, 0.0  ;;  %v746_v24 = vlaneseq }
 0x10f   :  { %646 = vmatpush1.bf16.msra.mxu1 %v514_v5  ;;  %v521_v39 = vpack.c.bf16 %v508_v31, %v507_v34  ;;  %v571_v1 = vpop.permute.xlu1 %570  ;;  %v747_v29 = vshrl.u32 %v746_v24, 7 }
 0x110   :  { %647 = vmatprep.subr.bf16.mxu1 %v1327_v3  ;;  %998 = vperm.xlu1 %1299, %v994_v61  }
 0x111   :  { %v748_v34 = vsub.s32 0, %v747_v29 }
 0x113   :  { %648 = vmatpush1.bf16.msra.mxu1 %v513_v14  ;;  %v728_v5 = vpop.permute.xlu1 %727  ;;  %v581_v14 = vpop.permute.xlu0 %580  ;;  %v749_v41 = vrot.slane %v1175_v36, %v748_v34  ;;  %v806_v42 = vrot.slane %v1176_v38, %v748_v34  ;;  %v863_v54 = vrot.slane %v1177_v44, %v748_v34 }
 0x114   :  { %649 = vmatprep.subr.bf16.mxu1 %v1327_v3  ;;  %1063 = vperm.xlu1 %1299, %v1060_v2  }
 0x115   :  { %v814_v2 = vmul.f32 %v806_v42, %v796_v11 }
 0x117   :  { %650 = vmatpush1.bf16.msra.mxu1 %v512_v18  ;;  %v733_v6 = vpop.permute.xlu1 %732  ;;  %v738_v16 = vpop.permute.xlu0 %737 }
 0x118   :  { %651 = vmatprep.subr.bf16.mxu1 %v1327_v3  ;;  %v757_v56 = vmul.f32 %v749_v41, %v738_v16 }
 0x11b   :  { %652 = vmatpush1.bf16.msra.mxu1 %v511_v4  ;;  %v1706_v7 = vpop.permute.xlu1 %856  ;;  %v576_v63 = vpop.permute.xlu0 %575 }
 0x11c   :  { %661 = vmatprep.subr.bf16.mxu1 %v1327_v3  ;;  %v872_v11 = vmul.f32 %v863_v54, %v1706_v7 }
 0x11f   :  { %662 = vmatpush2.bf16.msra.mxu1 %v522_v30  ;;  %v788_v9 = vpop.permute.xlu1 %787  ;;  %v718_v19 = vpop.permute.xlu0 %717 }
 0x120   :  { %663 = vmatprep.subr.bf16.mxu1 %v1327_v3  ;;  %v812_v0 = vmul.f32 %v806_v42, %v788_v9  ;;  %v753_v24 = vmul.f32 %v749_v41, %v718_v19 }
 0x123   :  { %664 = vmatpush2.bf16.msra.mxu1 %v521_v39  ;;  %v1708_v10 = vpop.permute.xlu1 %560  ;;  %v1718_v23 = vpop.permute.xlu0 %550 }
 0x124   :  { %665 = vmatprep.subr.bf16.mxu1 %v1327_v3 }
 0x127   :  { %666 = vmatpush2.bf16.msra.mxu1 %v520_v43  ;;  %v566_v12 = vpop.permute.xlu1 %565  ;;  %v713_v28 = vpop.permute.xlu0 %712 }
 0x128   :  { %667 = vmatprep.subr.bf16.mxu1 %v1327_v3  ;;  %v1317_v3 = vld [vmem:[%s1761_s4 + $0x10] ss:$8 sps:$4 sm:$0xff]   ;;  %v752_v62 = vmul.f32 %v749_v41, %v713_v28 }
 0x12b   :  { %668 = vmatpush2.bf16.msra.mxu1 %v519_v33  ;;  %v723_v8 = vpop.permute.xlu1 %722  ;;  %v853_v39 = vpop.permute.xlu0 %852 }
 0x12c   :  { %1270 = vmatprep.subr.bf16.mxu1 %v1331_v37 }
 0x12e   :  { %670 = vmatmul.mubr.bf16.vlgmr.msra.gmra.mxu1 %v1312_v46 }
 0x12f   :  { %1172 = vmatprep.mubr.msk.bf16.mxu1 %vm624_vm4, %v1315_v47  ;;  %v1710_v15 = vpop.permute.xlu1 %844  ;;  %v756_v47 = vmul.f32 %v749_v41, %v733_v6 }
 0x130   :  { %v869_v34 = vmul.f32 %v863_v54, %v1710_v15 }
 0x133   :  { %v1712_v17 = vpop.permute.xlu1 %779 }
 0x136   :  { %678 = vmatmul.mubr.bf16.gmra.mxu1 %v1317_v3  ;;  %v849_v3 = vpop.permute.xlu0 %848 }
 0x137   :  { %1173 = vmatprep.mubr.msk.bf16.mxu1 %vm624_vm4, %v1318_v48  ;;  %v1714_v18 = vpop.permute.xlu1 %783 }
 0x13a   :  { %v841_v16 = vpop.permute.xlu0 %840 }
 0x13b   :  { %v556_v21 = vpop.permute.xlu1 %555 }
 0x13e   :  { %686 = vmatmul.mubr.bf16.gmra.mxu1 %v1320_v49  ;;  %v758_v49 = vmul.f32 %v749_v41, %v1677_v53 }
 0x13f   :  { %1174 = vmatprep.mubr.msk.bf16.mxu1 %vm624_vm4, %v1321_v50  ;;  %v708_v26 = vpop.permute.xlu1 %707  ;;  %v815_v50 = vmul.f32 %v806_v42, %v1689_v57  ;;  %v871_v57 = vmul.f32 %v863_v54, %v853_v39 }
 0x143   :  { %v1723_v32 = vpop.permute.xlu1 %836 }
 0x146   :  { %694 = vmatmul.mubr.bf16.gmra.mxu1 %v1323_v51  ;;  %v755_v51 = vmul.f32 %v749_v41, %v728_v5  ;;  %v870_v5 = vmul.f32 %v863_v54, %v849_v3 }
 0x147   :  { %v772_v45 = vpop.permute.xlu1 %771  ;;  %1272 = vmatprep.mubr.msk.bf16.mxu1 %vm1332_vm7, %v1331_v37 }
 0x14b   :  { %v776_v6 = vpop.permute.xlu1 %775 }
 0x14c   :  { %v809_v36 = vmul.f32 %v806_v42, %v776_v6 }
 0x1ee   :  { %v1716_v59 = vpop.f32.mrf.mxu1 }
 0x1f0   :  { %v673_v20 = vpop.f32.mrf.mxu1 }
 0x1f1   :  { %v813_v20 = vmul.f32 %v806_v42, %v792_v13  ;;  %v810_v13 = vmul.f32 %v806_v42, %v1712_v17 }
 0x1f2   :  { %v674_v22 = vpop.f32.mrf.mxu1 }
 0x1f3   :  { %v675_v29 = vadd.f32 %v674_v22, %v556_v21 }
 0x1f4   :  { %v676_v4 = vpop.f32.mrf.mxu1 }
 0x1f5   :  { %v754_v4 = vmul.f32 %v749_v41, %v723_v8  ;;  %v811_v8 = vmul.f32 %v806_v42, %v1714_v18  ;;  %v760_v38 = vadd.f32 %v752_v62, %v675_v29  ;;  %v867_v18 = vmul.f32 %v863_v54, %v1723_v32 }
 0x1f6   :  { %v679_v25 = vpop.f32.mrf.mxu1 }
 0x1f8   :  { %v681_v27 = vpop.f32.mrf.mxu1 }
 0x1fa   :  { %v682_v30 = vpop.f32.mrf.mxu1 }
 0x1fb   :  { %v683_v58 = vadd.f32 %v682_v30, %v566_v12 }
 0x1fc   :  { %v684_v31 = vpop.f32.mrf.mxu1 }
 0x1fd   :  { %v762_v12 = vadd.f32 %v754_v4, %v683_v58 }
 0x1fe   :  { %v687_v35 = vpop.f32.mrf.mxu1 }
 0x1ff   :  { %v688_v48 = vadd.f32 %v687_v35, %v571_v1  ;;  %v680_v1 = vadd.f32 %v679_v25, %v1708_v10  ;;  %v751_v10 = vmul.f32 %v749_v41, %v708_v26  ;;  %v672_v25 = vadd.f32 %v1716_v59, %v1718_v23 }
 0x200   :  { %v689_v40 = vpop.f32.mrf.mxu1  ;;  %v868_v35 = vmul.f32 %v863_v54, %v841_v16  ;;  %v819_v39 = vadd.f32 %v811_v8, %v762_v12  ;;  %v808_v26 = vmul.f32 %v806_v42, %v772_v45 }
 0x201   :  { %v763_v27 = vadd.f32 %v755_v51, %v688_v48  ;;  %v761_v28 = vadd.f32 %v753_v24, %v680_v1  ;;  %v759_v41 = vadd.f32 %v751_v10, %v672_v25 }
 0x202   :  { %v690_v43 = vpop.f32.mrf.mxu1  ;;  %v876_v48 = vadd.f32 %v868_v35, %v819_v39 }
 0x203   :  { %v691_v33 = vadd.f32 %v690_v43, %v576_v63  ;;  %v820_v21 = vadd.f32 %v812_v0, %v763_v27  ;;  %v829_v43 = vpop.permute.xlu0 %828  ;;  %v818_v44 = vadd.f32 %v810_v13, %v761_v28  ;;  %v816_v51 = vadd.f32 %v808_v26, %v759_v41  ;;  %v1326_v13 = vld [vmem:[%s1767_s9] sm:$0xff]  }
 0x204   :  { %v692_v46 = vpop.f32.mrf.mxu1  ;;  %v884_v42 = vmax.f32 %v876_v48, 0.0 }
 0x205   :  { %v764_v60 = vadd.f32 %v756_v47, %v691_v33  ;;  %v877_v23 = vadd.f32 %v869_v34, %v820_v21  ;;  %v817_v33 = vadd.f32 %v809_v36, %v760_v38 }
 0x206   :  { %v695_v55 = vpop.f32.mrf.mxu1 }
 0x207   :  { %v696_v61 = vadd.f32 %v695_v55, %v581_v14  ;;  %v821_v30 = vadd.f32 %v813_v20, %v764_v60 }
 0x208   :  { %v697_v63 = vpop.f32.mrf.mxu1 }
 0x209   :  { %v765_v53 = vadd.f32 %v757_v56, %v696_v61  ;;  %v878_v17 = vadd.f32 %v870_v5, %v821_v30  ;;  %v875_v56 = vadd.f32 %v867_v18, %v818_v44  ;;  %v914_v63 = vpop.permute.xlu0 %913 }
 0x20a   :  { %v698_v31 = vpop.f32.mrf.mxu1 }
 0x20b   :  { %v822_v14 = vadd.f32 %v814_v2, %v765_v53  ;;  %v699_v9 = vadd.f32 %v698_v31, %v1675_v52  ;;  %v833_v52 = vpop.permute.xlu1 %832  ;;  %v886_v3 = vmax.f32 %v878_v17, 0.0  ;;  %v883_v60 = vmax.f32 %v875_v56, 0.0 }
 0x20c   :  { %v700_v19 = vpop.f32.mrf.mxu1  ;;  %v866_v46 = vmul.f32 %v863_v54, %v833_v52 }
 0x20d   :  { %v766_v22 = vadd.f32 %v758_v49, %v699_v9  ;;  %v879_v40 = vadd.f32 %v871_v57, %v822_v14  ;;  %v865_v49 = vmul.f32 %v863_v54, %v829_v43  ;;  %v890_v0 = vpack.c.bf16 %v884_v42, %v883_v60  ;;  %v1325_v54 = vld [vmem:[%s1762_s7 + $0x8] sm:$0xff]   ;;  %v909_v57 = vpop.permute.xlu0 %908 }
 0x20e   :  { %v874_v58 = vadd.f32 %v866_v46, %v817_v33 }
 0x20f   :  { %v823_v7 = vadd.f32 %v815_v50, %v766_v22  ;;  %v887_v47 = vmax.f32 %v879_v40, 0.0  ;;  %v885_v50 = vmax.f32 %v877_v23, 0.0  ;;  %v873_v45 = vadd.f32 %v865_v49, %v816_v51  ;;  %v919_v4 = vpop.permute.xlu1 %918 }
 0x210   :  { %v882_v61 = vmax.f32 %v874_v58, 0.0 }
 0x211   :  { %v880_v59 = vadd.f32 %v872_v11, %v823_v7  ;;  %v891_v32 = vpack.c.bf16 %v886_v3, %v885_v50  ;;  %v881_v2 = vmax.f32 %v873_v45, 0.0  ;;  %v1004_v28 = vpop.permute.xlu0 %1003 }
 0x213   :  { %v888_v15 = vmax.f32 %v880_v59, 0.0  ;;  %v889_v20 = vpack.c.bf16 %v882_v61, %v881_v2  ;;  %v904_v53 = vpop.permute.xlu1 %903 }
 0x215   :  { %v892_v55 = vpack.c.bf16 %v888_v15, %v887_v47 }
 0x217   :  { %1250 = vmatprep.subr.bf16.mxu0 %v892_v55  ;;  %v999_v10 = vpop.permute.xlu1 %998 }
 0x218   :  { %1251 = vmatpush3.bf16.msra.mxu0 %v892_v55 }
 0x219   :  { %1252 = vmatprep.subr.bf16.mxu0 %v891_v32 }
 0x21b   :  { %v1064_v52 = vpop.permute.xlu1 %1063 }
 0x21c   :  { %1253 = vmatpush3.bf16.msra.mxu0 %v891_v32 }
 0x21d   :  { %1254 = vmatprep.subr.bf16.mxu0 %v890_v0 }
 0x220   :  { %1255 = vmatpush3.bf16.msra.mxu0 %v890_v0 }
 0x221   :  { %1256 = vmatprep.subr.bf16.mxu0 %v889_v20 }
 0x224   :  { %1257 = vmatpush3.bf16.msra.mxu0 %v889_v20 }
 0x225   :  { %1262 = vmatprep.subr.bf16.mxu0 %v1331_v37 }
 0x227   :  { %1259 = vmatmul.mubr.msk.bf16.vlgmr.msra.gmra.mxu0 %vm624_vm4, %v1325_v54 }
 0x228   :  { %1266 = vmatprep.mubr.msk.bf16.mxu0 %vm1332_vm7, %v1331_v37 }
 0x2e7   :  { %v1260_v24 = vpop.f32.mrf.mxu0 }
 0x2e8   :  { %v980_v1 = vadd.f32 %v1260_v24, %v914_v63 }
 0x2e9   :  { %v971_v6 = vpop.f32.mrf.mxu0 }
 0x2ea   :  { %v988_v29 = vmax.f32 %v980_v1, 0.0  ;;  %v972_v31 = vadd.f32 %v971_v6, %v904_v53 }
 0x2eb   :  { %v1261_v27 = vpop.f32.mrf.mxu0 }
 0x2ec   :  { %v983_v62 = vadd.f32 %v1261_v27, %v919_v4  ;;  %v986_v9 = vmax.f32 %v972_v31, 0.0 }
 0x2ed   :  { %v974_v5 = vpop.f32.mrf.mxu0 }
 0x2ee   :  { %v989_v16 = vmax.f32 %v983_v62, 0.0  ;;  %v975_v12 = vadd.f32 %v974_v5, %v909_v57 }
 0x2f0   :  { %v991_v30 = vpack.c.bf16 %v989_v16, %v988_v29  ;;  %v987_v14 = vmax.f32 %v975_v12, 0.0 }
 0x2f2   :  { %1263 = vmatpush3.bf16.msra.mxu0 %v991_v30  ;;  %v990_v11 = vpack.c.bf16 %v987_v14, %v986_v9 }
 0x2f3   :  { %1264 = vmatprep.subr.bf16.mxu0 %v1331_v37  ;;  %v1059_v37 = vld [vmem:[%s1768_s11] sm:$0xf] }
 0x2f6   :  { %1265 = vmatpush3.bf16.msra.mxu0 %v990_v11 }
 0x2f9   :  { %1267 = vmatmul.mubr.msk.bf16.vlgmr.msra.gmra.mxu0 %vm1011_vm8, %v1326_v13 }
 0x3b9   :  { %v1049_v8 = vpop.f32.mrf.mxu0 }
 0x3ba   :  { %v1050_v25 = vadd.f32 %v1049_v8, %v999_v10 }
 0x3bb   :  { %v1268_v19 = vpop.f32.mrf.mxu0 }
 0x3bc   :  { %v1056_v35 = vmax.f32 %v1050_v25, 0.0 }
 0x3bd   :  { %v1052_v21 = vpop.f32.mrf.mxu0 }
 0x3be   :  { %v1053_v22 = vadd.f32 %v1052_v21, %v1004_v28 }
 0x3bf   :  { %v1269_v34 = vpop.f32.mrf.mxu0 }
 0x3c0   :  { %v1057_v36 = vmax.f32 %v1053_v22, 0.0 }
 0x3c2   :  { %v1058_v38 = vpack.c.bf16 %v1057_v36, %v1056_v35 }
 0x3c4   :  { %1271 = vmatpush3.bf16.msra.mxu1 %v1058_v38 }
 0x3c7   :  { %1273 = vmatmul.mubr.msk.bf16.vlgmr.msra.gmra.mxu1 %vm1066_vm9, %v1059_v37 }
 0x487   :  { %v1104_v39 = vpop.f32.mrf.mxu1 }
 0x488   :  { %v1105_v7 = vadd.f32 %v1104_v39, %v1064_v52 }
 0x489   :  { %v1274_v40 = vpop.f32.mrf.mxu1 }
 0x48a   :  { %1110 = vst [vmem:[%s1769_s13] sm:$0xff] %v1105_v7 }
 0x48b   :  { %v1107_v17 = vpop.f32.mrf.mxu1 }
 0x48d   :  { %v1275_v18 = vpop.f32.mrf.mxu1 }

</bundles_post_ra>
